<compile_context>
chip_gen: v6e
topology: v6e:2x2x1
jax: 0.10.0
libtpu: 0.0.40
codegen_flags: <defaults>
</compile_context>

<pallas_src>
import jax
import jax.numpy as jnp
from jax.experimental import pallas as pl
from jax.experimental.pallas import tpu as pltpu


def _store_zeros_kernel(x_hbm_ref, o_ref):
    # Grid only covers the X[:, :2] region of the aliased output; just store zeros.
    # The input is intentionally never read; unwritten bytes keep the input's data.
    del x_hbm_ref
    o_ref[...] = jnp.zeros_like(o_ref)


# Per-tile VMEM budget.  Only the (write-only) output moves through VMEM and is
# double-buffered, so scoped VMEM use is ~2x this.  6 MiB -> 12 MiB: fits v5e's
# 16 MiB default scoped VMEM and leaves headroom on v7x (32 MiB default / 64 MiB).
_TILE_BYTES_BUDGET = 6 * 1024 * 1024
_MAX_COL_TILE = 32768    # lane-dim cap: long contiguous bursts, bounded tiles
_MAX_ROW_TILE = 1024


def _sublane_multiple(itemsize: int) -> int:
    # dtype-aware sublane packing: f32 -> 8, bf16/f16 -> 16, int8/fp8 -> 32.
    return {4: 8, 2: 16, 1: 32}.get(itemsize, 8)


def _pick_col_tile(zero_cols: int, row_min: int, itemsize: int) -> int:
    """Largest 128-multiple divisor of zero_cols that fits the VMEM budget."""
    nb = zero_cols // 128
    col_tile = 128
    for k in range(1, nb + 1):
        if nb % k == 0:
            cand = (nb // k) * 128
            if cand <= _MAX_COL_TILE and cand * row_min * itemsize <= _TILE_BYTES_BUDGET:
                col_tile = cand
                break
    return col_tile


def _pick_row_tile(n: int, row_bytes: int, sub: int) -> int:
    """Largest divisor of n that is a multiple of `sub` and fits the budget."""
    if n % sub != 0:
        return n  # full extent: always a legal second-minor block dim
    best = sub
    d = sub
    while d <= min(n, _MAX_ROW_TILE):
        if n % d == 0 and d * row_bytes <= _TILE_BYTES_BUDGET:
            best = d
        d += sub
    return best


def subscript_assign(x: jax.Array) -> jax.Array:
    """Functional equivalent of PyTorch's in-place `X[:, :2] = 0; return X`."""
    n, c, h, w = x.shape
    zero_ch = min(2, c)
    hw = h * w
    if n == 0 or zero_ch == 0 or hw == 0:
        return x  # nothing to zero

    itemsize = x.dtype.itemsize
    sub = _sublane_multiple(itemsize)
    zero_cols = zero_ch * hw
    cost = pl.CostEstimate(flops=0, transcendentals=0,
                           bytes_accessed=n * zero_cols * itemsize)

    if zero_cols % 128 == 0:
        # ---------- fast path: lane-dense 2-D view, unmasked full-vreg stores ----------
        chw = c * hw
        row_min = sub if n % sub == 0 else n
        col_tile = _pick_col_tile(zero_cols, row_min, itemsize)
        row_tile = _pick_row_tile(n, col_tile * itemsize, sub)

        # v7x has 2 TensorCores: give a "parallel" axis >= 2 steps when possible so
        # both cores drive their own writeback DMA stream (no-op on v5e/v6e).
        if (n // row_tile) * (zero_cols // col_tile) == 1:
            nb = zero_cols // 128
            if nb >= 2:
                for k in range(2, nb + 1):
                    if nb % k == 0:
                        col_tile = (nb // k) * 128
                        break
            elif n % sub == 0 and n // sub >= 2:
                row_tile = sub

        grid = (n // row_tile, zero_cols // col_tile)
        vmem_needed = 2 * row_tile * col_tile * itemsize
        cp_kwargs = dict(dimension_semantics=("parallel", "parallel"))
        if vmem_needed > (14 << 20):  # only in the row_tile == n fallback for huge n
            cp_kwargs["vmem_limit_bytes"] = vmem_needed + (2 << 20)

        x2 = x.reshape(n, chw)  # free bitcast inside jit
        out2 = pl.pallas_call(
            _store_zeros_kernel,
            out_shape=jax.ShapeDtypeStruct((n, chw), x.dtype),
            grid=grid,
            in_specs=[pl.BlockSpec(memory_space=pl.ANY)],  # raw HBM ref, never read
            out_specs=pl.BlockSpec((row_tile, col_tile), lambda i, j: (i, j)),
            input_output_aliases={0: 0},  # in-place: unwritten region == input data
            cost_estimate=cost,
            compiler_params=pltpu.CompilerParams(**cp_kwargs),
        )(x2)
        return out2.reshape(n, c, h, w)

    # ---------- general path: 4-D blocks (row_tile, zero_ch, H, W) ----------
    # Last two block dims equal the full array dims, which is always legal, so this
    # handles arbitrary H, W (e.g. h=w=10); stores are only masked on ragged lanes.
    row_bytes = zero_ch * hw * itemsize
    row_tile = _pick_row_tile(n, row_bytes, sub)
    if n // row_tile == 1 and n % sub == 0 and n // sub >= 2:
        row_tile = sub  # >= 2 parallel steps for v7x's two TensorCores
    grid = (n // row_tile,)
    vmem_needed = 2 * row_tile * row_bytes
    cp_kwargs = dict(dimension_semantics=("parallel",))
    if vmem_needed > (14 << 20):
        cp_kwargs["vmem_limit_bytes"] = vmem_needed + (2 << 20)

    return pl.pallas_call(
        _store_zeros_kernel,
        out_shape=jax.ShapeDtypeStruct((n, c, h, w), x.dtype),
        grid=grid,
        in_specs=[pl.BlockSpec(memory_space=pl.ANY)],
        out_specs=pl.BlockSpec((row_tile, zero_ch, h, w), lambda i: (i, 0, 0, 0)),
        input_output_aliases={0: 0},
        cost_estimate=cost,
        compiler_params=pltpu.CompilerParams(**cp_kwargs),
    )(x)


# Public entry point: donate x so input_output_aliases={0:0} really reuses the
# original HBM buffer (no defensive full-tensor copy), matching PyTorch's in-place
# semantics.  Callers must not read x after the call (it is consumed).
subscript_assign_jit = jax.jit(subscript_assign, donate_argnums=0)


if __name__ == "__main__":
    key = jax.random.PRNGKey(0)
    x = jax.random.normal(key, (2, 4, 16, 16), dtype=jnp.float32)

    # Reference and saved tail are computed BEFORE the call: x is donated to the
    # kernel and must not be read afterwards.
    ref = jax.block_until_ready(x.at[:, :2].set(0.0))
    x_tail = jax.block_until_ready(x[:, 2:])

    out = jax.block_until_ready(subscript_assign_jit(x))

    assert out.shape == ref.shape and out.dtype == ref.dtype
    assert jnp.all(out[:, :2] == 0), "zeroed channels are not zero"
    assert jnp.allclose(out[:, 2:], x_tail), "untouched channels changed"
    assert jnp.allclose(out, ref), "mismatch vs reference"

    print("KERNEL_OK")
</pallas_src>

<mosaic_0001>
module attributes {stable_mosaic.version = 11 : i64} {
  func.func @_store_zeros_kernel(%arg0: i32, %arg1: i32, %arg2: memref<2x1024xf32, #tpu.memory_space<any>>, %arg3: memref<2x256xf32, #tpu.memory_space<vmem>>) attributes {dimension_semantics = [#tpu.dimension_semantics<parallel>, #tpu.dimension_semantics<parallel>], iteration_bounds = array<i64: 1, 2>, scalar_prefetch = 0 : i64, scratch_operands = 0 : i64, tpu.core_type = #tpu.core_type<tc>, window_params = [{}, {transform_indices = @transform_1, window_bounds = array<i64: 2, 256>}]} {
    %cst = arith.constant 0.000000e+00 : f32
    %0 = vector.broadcast %cst : f32 to vector<2x256xf32>
    %c0 = arith.constant 0 : index
    %c0_0 = arith.constant 0 : index
    %1 = vector.load %arg3[%c0, %c0_0] : memref<2x256xf32, #tpu.memory_space<vmem>>, vector<2x256xf32>
    tpu.vector_store %arg3[%c0, %c0_0], %0 {strides = array<i32>} : memref<2x256xf32, #tpu.memory_space<vmem>>, vector<2x256xf32>,
    return
  }
  func.func @transform_1(%arg0: i32, %arg1: i32) -> (i32, i32) {
    %c0_i32 = arith.constant 0 : i32
    return %arg0, %arg1 : i32, i32
  }
}

</mosaic_0001>

<bundles_post_ra>
// kernel: subscript_assign.1
= control target key start
LH: loop header
LB: loop body
LE: loop exit
PB: predicated region body
PF: predicated region fallthrough
CT: control target
= control target key end

     0   :  { %s164_s6 = smov 0   ;;  %s168_s7 = smov 0   ;;  %s186_s0 = inlined_call_operand.vmem [shape: f32[2,1024], index: 0, kind: input, shape index: {}, may-alias: {0,1}]   ;;  %s187_s1 = inlined_call_operand.vmem [shape: f32[2,1024], index: 1, kind: output, shape index: {}, may-alias: {0,1}]  }
   0x1 LB: > { %s17_s8 = sadd.s32 1, %s166_s6  ;;  %p133_p1 = scmp.ge.s32.totalorder %s170_s7, 2  ;;  %s170_s7 = sphi %s168_s7, %s11_s7   ;;  %s166_s6 = sphi %s164_s6, %s165_s6  }
   0x2   : > { %p18_p0 = scmp.ge.s32.totalorder %s17_s8, 2  ;;  %s163_s9 = sshll.u32 (!%p133_p1), %s166_s6, 2 }
   0x3   : > { %48 = sbr.rel (%p133_p1) target bundleno = 10 (0xa), region = 12  ;;  %s68_s12 = scalar_lea.vmem (!%p133_p1), %s187_s1, %s163_s9 }
   0x4   : > { %s189_s8 = smov (%p18_p0, %s17_s8), 0 }
   0x8   : > { %v172_v0 = vmov 0.0  }
   0x9   : > { %70 = vst [vmem:[%s68_s12] sm:$0xf] %v172_v0 }
   0xa PF: > { %s11_s7 = sadd.s32 1, %s170_s7   ;;  %s165_s6 = smov %s189_s8  }
   0xb   : > { %p8_p2 = scmp.ge.s32.totalorder %s11_s7, 3  }
   0xd   :  { %10 = sbr.rel (!%p8_p2) target bundleno = 1 (0x1), region = 39 }

</bundles_post_ra>
